<compile_context>
chip_gen: v7x
topology: tpu7x:2x2x1
jax: 0.10.0
libtpu: 0.0.40
codegen_flags: <defaults>
</compile_context>

<pallas_src>
import functools

import jax
import jax.numpy as jnp
from jax import lax
from jax.experimental import pallas as pl
from jax.experimental.pallas import tpu as pltpu


def _make_logits_kernel(scale, has_bias):
    """Kernel over one (tm, tn) output tile; reduction over hidden on axis 2."""

    def kernel(*refs):
        if has_bias:
            h_ref, e_ref, b_ref, o_ref = refs
        else:
            h_ref, e_ref, o_ref = refs

        k = pl.program_id(2)

        @pl.when(k == 0)
        def _():
            o_ref[...] = jnp.zeros_like(o_ref)

        # h_ref: (tm, tk), e_ref: (tn, tk) -> (tm, tn); contract on the last
        # dims so the RHS feeds the MXU in its natural (stationary) form with
        # no transpose / relayout per grid step.
        o_ref[...] += lax.dot_general(
            h_ref[...],
            e_ref[...],
            dimension_numbers=(((1,), (1,)), ((), ())),
            preferred_element_type=jnp.float32,
        )

        @pl.when(k == pl.num_programs(2) - 1)
        def _():
            r = o_ref[...]
            if has_bias:
                r = r + b_ref[...]
            o_ref[...] = r * scale

    return kernel


def _pick_tiles(m, d, v_out, itemsize, vmem_budget=48 * 1024 * 1024):
    """Pick (tm, tn, tk) under a VMEM budget that is safe on v7x (64 MiB)."""
    # Rows: the sampling path has few selected tokens; keep them in one block.
    tm = 256 if (m > 256 and m % 256 == 0) else m

    # Reduction tile: largest multiple of 128 dividing d (else full d).
    tk = d
    for cand in (2048, 1024, 512, 256, 128):
        if d % cand == 0:
            tk = cand
            break

    def footprint(tn, tk):
        return (2 * (tm * tk + tn * tk) * itemsize  # double-buffered hidden + emb
                + 2 * tn * 4                        # bias (f32)
                + 2 * tm * tn * 4)                  # f32 output (resident acc)

    # Vocab tile: largest lane-dense multiple of 128 dividing v_out that fits.
    tn = None
    for cand in (2048, 1024, 512, 256, 128):
        if v_out % cand == 0 and footprint(cand, tk) <= vmem_budget:
            tn = cand
            break
    if tn is None:
        tn = v_out  # tiny / irregular vocab fallback (full-dim block)

    # If still over budget, shrink the reduction tile (keeps tn, the real lever).
    while (footprint(tn, tk) > vmem_budget and tk % 256 == 0
           and d % (tk // 2) == 0):
        tk //= 2

    return tm, tn, tk


def _get_logits_pallas(hidden, embedding, bias, *, scale, org_vocab_size):
    """logits[:, :org_vocab] = (hidden @ embedding.T + bias) * scale in Pallas."""
    m, d = hidden.shape
    v, d2 = embedding.shape
    assert d == d2
    has_bias = bias is not None

    v_out = min(org_vocab_size, v)
    # Size the kernel output directly to org_vocab when it is lane-tileable;
    # otherwise fall back to computing full (padded) vocab + a JAX slice.
    if v_out % 128 == 0 or v_out == v:
        v_compute, post_slice = v_out, False
    else:
        v_compute, post_slice = v, True

    itemsize = jnp.dtype(embedding.dtype).itemsize
    tm, tn, tk = _pick_tiles(m, d, v_compute, itemsize)

    grid = (pl.cdiv(m, tm), pl.cdiv(v_compute, tn), pl.cdiv(d, tk))

    in_specs = [
        pl.BlockSpec((tm, tk), lambda i, j, k: (i, k)),   # hidden
        pl.BlockSpec((tn, tk), lambda i, j, k: (j, k)),   # embedding
    ]
    args = [hidden, embedding]
    if has_bias:
        in_specs.append(pl.BlockSpec((1, tn), lambda i, j, k: (0, j)))
        args.append(bias.reshape(1, v).astype(jnp.float32))

    # Raise the scoped VMEM limit only when the chosen tiles need it.
    vmem_bytes = (2 * (tm * tk + tn * tk) * itemsize
                  + (2 * tn * 4 if has_bias else 0)
                  + 2 * tm * tn * 4)
    cp_kwargs = dict(dimension_semantics=("parallel", "parallel", "arbitrary"))
    if vmem_bytes > (32 << 20):
        cp_kwargs["vmem_limit_bytes"] = int(min(int(vmem_bytes * 1.3), 100 << 20))

    logits = pl.pallas_call(
        _make_logits_kernel(scale, has_bias),
        out_shape=jax.ShapeDtypeStruct((m, v_compute), jnp.float32),
        grid_spec=pltpu.PrefetchScalarGridSpec(
            num_scalar_prefetch=0,
            grid=grid,
            in_specs=in_specs,
            out_specs=pl.BlockSpec((tm, tn), lambda i, j, k: (i, j)),
        ),
        compiler_params=pltpu.CompilerParams(**cp_kwargs),
    )(*args)

    if post_slice:
        logits = logits[:, :v_out]
    return logits


class LogitsProcessorPallas:
    """JAX/Pallas port of aphrodite LogitsProcessor forward."""

    def __init__(self, vocab_size, org_vocab_size=None, scale=1.0,
                 logits_as_input=False):
        self.scale = scale
        self.vocab_size = vocab_size
        self.org_vocab_size = org_vocab_size or vocab_size
        self.logits_as_input = logits_as_input

    def __call__(self, embedding, hidden_states, selected_token_indices,
                 embedding_bias=None):
        if self.logits_as_input:
            # PyTorch path: logits = hidden_states, then *= scale (no truncation).
            logits = hidden_states * self.scale
        else:
            # _prune_hidden_states: tiny (m x d) row gather kept in plain JAX
            # (BlockSpec tiles are rectangular; fusing it would force tm=1).
            pruned = jnp.take(hidden_states, selected_token_indices, axis=0)
            logits = _get_logits_pallas(
                pruned, embedding, embedding_bias,
                scale=self.scale, org_vocab_size=self.org_vocab_size,
            )
            # tensor_model_parallel_gather -> identity on a single device.
        # TODO(synk): _apply_logits_processors runs arbitrary per-sequence
        # Python callbacks over output_token_ids; no Pallas equivalent.
        return logits


if __name__ == "__main__":
    key = jax.random.PRNGKey(0)
    k1, k2, k3 = jax.random.split(key, 3)

    num_tokens, hidden_dim = 8, 384
    vocab_size, org_vocab_size = 512, 384     # padded vocab > org vocab
    scale = 0.5

    hidden_f32 = jax.random.normal(k1, (num_tokens, hidden_dim), jnp.float32)
    emb_f32 = jax.random.normal(k2, (vocab_size, hidden_dim), jnp.float32) * 0.02
    embedding_bias = jax.random.normal(k3, (vocab_size,), jnp.float32) * 0.01
    selected_token_indices = jnp.array([1, 3, 5, 7], dtype=jnp.int32)

    # Stream activations/embedding in bf16 (mem-bound dtype), accumulate in f32.
    hidden_bf16 = hidden_f32.astype(jnp.bfloat16)
    emb_bf16 = emb_f32.astype(jnp.bfloat16)

    lp = LogitsProcessorPallas(vocab_size, org_vocab_size, scale=scale)

    logits = lp(emb_bf16, hidden_bf16, selected_token_indices, embedding_bias)
    jax.block_until_ready(logits)

    pruned_ref = jnp.take(hidden_bf16, selected_token_indices, axis=0).astype(jnp.float32)
    ref = (pruned_ref @ emb_bf16.astype(jnp.float32).T + embedding_bias) * scale
    ref = ref[:, :org_vocab_size]
    assert logits.shape == (selected_token_indices.shape[0], org_vocab_size)
    assert logits.dtype == jnp.float32
    assert jnp.allclose(logits, ref, atol=1e-2, rtol=1e-2), \
        float(jnp.max(jnp.abs(logits - ref)))

    # bias=None -> bias-free kernel variant (no zeros vector allocated/streamed).
    logits_nb = lp(emb_bf16, hidden_bf16, selected_token_indices, None)
    jax.block_until_ready(logits_nb)
    ref_nb = (pruned_ref @ emb_bf16.astype(jnp.float32).T)[:, :org_vocab_size] * scale
    assert jnp.allclose(logits_nb, ref_nb, atol=1e-2, rtol=1e-2)

    print("KERNEL_OK")
</pallas_src>

<mosaic_0001>
module attributes {stable_mosaic.version = 11 : i64} {
  func.func @kernel(%arg0: i32, %arg1: i32, %arg2: i32, %arg3: memref<4x128xbf16, #tpu.memory_space<vmem>>, %arg4: memref<128x128xbf16, #tpu.memory_space<vmem>>, %arg5: memref<1x128xf32, #tpu.memory_space<vmem>>, %arg6: memref<4x128xf32, #tpu.memory_space<vmem>>) attributes {dimension_semantics = [#tpu.dimension_semantics<parallel>, #tpu.dimension_semantics<parallel>, #tpu.dimension_semantics<arbitrary>], iteration_bounds = array<i64: 1, 3, 3>, scalar_prefetch = 0 : i64, scratch_operands = 0 : i64, tpu.core_type = #tpu.core_type<tc>, window_params = [{transform_indices = @transform_0, window_bounds = array<i64: 4, 128>}, {transform_indices = @transform_1, window_bounds = array<i64: 128, 128>}, {transform_indices = @transform_2, window_bounds = array<i64: 1, 128>}, {transform_indices = @transform_3, window_bounds = array<i64: 4, 128>}]} {
    %c0_i32 = arith.constant 0 : i32
    %0 = arith.cmpi eq, %arg2, %c0_i32 : i32
    %1 = arith.extui %0 : i1 to i32
    %c0_i32_0 = arith.constant 0 : i32
    %2 = arith.cmpi ne, %1, %c0_i32_0 : i32
    scf.if %2 {
      %cst_9 = arith.constant 0.000000e+00 : f32
      %12 = vector.broadcast %cst_9 : f32 to vector<4x128xf32>
      %c0_10 = arith.constant 0 : index
      %c0_11 = arith.constant 0 : index
      %13 = vector.load %arg6[%c0_10, %c0_11] : memref<4x128xf32, #tpu.memory_space<vmem>>, vector<4x128xf32>
      tpu.vector_store %arg6[%c0_10, %c0_11], %12 {strides = array<i32>} : memref<4x128xf32, #tpu.memory_space<vmem>>, vector<4x128xf32>,
    } else {
    }
    %c0 = arith.constant 0 : index
    %c0_1 = arith.constant 0 : index
    %3 = vector.load %arg6[%c0, %c0_1] : memref<4x128xf32, #tpu.memory_space<vmem>>, vector<4x128xf32>
    %c0_2 = arith.constant 0 : index
    %c0_3 = arith.constant 0 : index
    %4 = vector.load %arg3[%c0_2, %c0_3] : memref<4x128xbf16, #tpu.memory_space<vmem>>, vector<4x128xbf16>
    %c0_4 = arith.constant 0 : index
    %c0_5 = arith.constant 0 : index
    %5 = vector.load %arg4[%c0_4, %c0_5] : memref<128x128xbf16, #tpu.memory_space<vmem>>, vector<128x128xbf16>
    %cst = arith.constant dense<0.000000e+00> : vector<4x128xf32>
    %6 = tpu.matmul %4, %5, %cst {dimension_numbers = #tpu.dot_dimension_numbers<[1], [1], [0], [0], [0, 0, 1, 0], [], []>} : vector<4x128xbf16>, vector<128x128xbf16>, vector<4x128xf32> -> vector<4x128xf32>
    %7 = arith.addf %3, %6 : vector<4x128xf32>
    %c0_6 = arith.constant 0 : index
    %c0_7 = arith.constant 0 : index
    %8 = vector.load %arg6[%c0_6, %c0_7] : memref<4x128xf32, #tpu.memory_space<vmem>>, vector<4x128xf32>
    tpu.vector_store %arg6[%c0_6, %c0_7], %7 {strides = array<i32>} : memref<4x128xf32, #tpu.memory_space<vmem>>, vector<4x128xf32>,
    %c2_i32 = arith.constant 2 : i32
    %9 = arith.cmpi eq, %arg2, %c2_i32 : i32
    %10 = arith.extui %9 : i1 to i32
    %c0_i32_8 = arith.constant 0 : i32
    %11 = arith.cmpi ne, %10, %c0_i32_8 : i32
    scf.if %11 {
      %c0_9 = arith.constant 0 : index
      %c0_10 = arith.constant 0 : index
      %12 = vector.load %arg6[%c0_9, %c0_10] : memref<4x128xf32, #tpu.memory_space<vmem>>, vector<4x128xf32>
      %c0_11 = arith.constant 0 : index
      %c0_12 = arith.constant 0 : index
      %13 = vector.load %arg5[%c0_11, %c0_12] : memref<1x128xf32, #tpu.memory_space<vmem>>, vector<1x128xf32>
      %14 = vector.broadcast %13 : vector<1x128xf32> to vector<4x128xf32>
      %15 = arith.addf %12, %14 : vector<4x128xf32>
      %cst_13 = arith.constant 5.000000e-01 : f32
      %16 = vector.broadcast %cst_13 : f32 to vector<4x128xf32>
      %17 = arith.mulf %15, %16 : vector<4x128xf32>
      %c0_14 = arith.constant 0 : index
      %c0_15 = arith.constant 0 : index
      %18 = vector.load %arg6[%c0_14, %c0_15] : memref<4x128xf32, #tpu.memory_space<vmem>>, vector<4x128xf32>
      tpu.vector_store %arg6[%c0_14, %c0_15], %17 {strides = array<i32>} : memref<4x128xf32, #tpu.memory_space<vmem>>, vector<4x128xf32>,
    } else {
    }
    return
  }
  func.func @transform_0(%arg0: i32, %arg1: i32, %arg2: i32) -> (i32, i32) {
    %c0_i32 = arith.constant 0 : i32
    return %arg0, %arg2 : i32, i32
  }
  func.func @transform_1(%arg0: i32, %arg1: i32, %arg2: i32) -> (i32, i32) {
    %c0_i32 = arith.constant 0 : i32
    return %arg1, %arg2 : i32, i32
  }
  func.func @transform_2(%arg0: i32, %arg1: i32, %arg2: i32) -> (i32, i32) {
    %c0_i32 = arith.constant 0 : i32
    %c0_i32_0 = arith.constant 0 : i32
    return %c0_i32, %arg1 : i32, i32
  }
  func.func @transform_3(%arg0: i32, %arg1: i32, %arg2: i32) -> (i32, i32) {
    %c0_i32 = arith.constant 0 : i32
    return %arg0, %arg1 : i32, i32
  }
}

</mosaic_0001>

<bundles_post_ra>
// kernel: tpu_custom_call.1
= control target key start
LH: loop header
LB: loop body
LE: loop exit
PB: predicated region body
PF: predicated region fallthrough
CT: control target
= control target key end

     0   :  { %s1354_s0 = inlined_call_operand.hbm [shape: bf16[4,384], index: 0, kind: input, shape index: {}]   ;;  %s1355_s1 = inlined_call_operand.hbm [shape: bf16[512,384], index: 1, kind: input, shape index: {}]   ;;  %s1356_s2 = inlined_call_operand.vmem [shape: f32[1,512], index: 2, kind: input, shape index: {}]   ;;  %s1357_s3 = inlined_call_operand.hbm [shape: f32[4,384], index: 3, kind: output, shape index: {}]  }
   0x1   :  { %1366 = sst [smem:[#allocation19_spill]] %s1354_s0 }
   0x2   :  { %8 = vsyncpa [#allocation3], 0 }
   0x3   :  { %10 = vsyncpa [#allocation3 + $0x1], 0 }
   0x4   :  { %11 = vsyncpa [#allocation6], 0 }
   0x5   :  { %13 = vsyncpa [#allocation6 + $0x1], 0 }
   0x6   :  { %14 = vsyncpa [#allocation4], 0 }
   0x7   :  { %16 = vsyncpa [#allocation4 + $0x1], 0  ;;  %s982_s12 = smov 0   ;;  %s984_s13 = smov 0  }
   0x8   :  { %s986_s14 = smov 0   ;;  %s988_s15 = smov 0  }
   0x9   :  { %s990_s16 = smov 0   ;;  %s992_s17 = smov 0  }
   0xa   :  { %s994_s18 = smov 0   ;;  %s996_s19 = smov 0  }
   0xb   :  { %s998_s20 = smov 0   ;;  %s1000_s21 = smov 0  }
   0xc   :  { %s1002_s22 = smov 0   ;;  %s1004_s23 = smov 0  }
   0xd   :  { %s1006_s24 = smov 0   ;;  %s1008_s25 = smov 0  }
   0xe LB: > { %1367 = sst [smem:[#allocation11_spill]] %s907_s14  ;;  %s537_s26 = sadd.s32 4294967295, %s951_s25   ;;  %s951_s25 = sphi %s1008_s25, %s22_s25   ;;  %s947_s24 = sphi %s1006_s24, %s1414_s24   ;;  %s943_s23 = sphi %s1004_s23, %s1413_s23   ;;  %s939_s22 = sphi %s1002_s22, %s1412_s22   ;;  %s935_s21 = sphi %s1000_s21, %s1411_s21   ;;  %s931_s20 = sphi %s998_s20, %s1399_s20   ;;  %s927_s19 = sphi %s996_s19, %s1410_s19   ;;  %s923_s18 = sphi %s994_s18, %s1409_s18   ;;  %s919_s17 = sphi %s992_s17, %s1408_s17   ;;  %s915_s16 = sphi %s990_s16, %s1407_s16   ;;  %s911_s15 = sphi %s988_s15, %s1406_s15   ;;  %s907_s14 = sphi %s986_s14, %s1405_s14   ;;  %s903_s13 = sphi %s984_s13, %s1404_s13   ;;  %s899_s12 = sphi %s982_s12, %s1403_s12  }
   0xf   : > { %1368 = sst [smem:[#allocation12_spill]] %s931_s20  ;;  %s34_s28 = sadd.s32 1, %s943_s23 }
  0x10   : > { %s37_s29 = sadd.s32 1, %s947_s24  ;;  %p35_p0 = scmp.ge.s32.totalorder %s34_s28, 3 }
  0x11   : > { %s50_s30 = sadd.s32 1, %s931_s20  ;;  %p57_p1 = scmp.ne.s32.totalorder %s931_s20, %s927_s19 }
  0x12   : > { %p58_p2 = scmp.eq.s32.totalorder %s951_s25, 0  ;;  %s1416_s28 = smov (%p35_p0, %s34_s28), 0 }
  0x13   : > { %1369 = sst [smem:[#allocation13_spill]] %s1416_s28  ;;  %s1418_s29 = smov (!%p35_p0, %s37_s29), %s947_s24 }
  0x14   : > { %s46_s4 = ssub.s32 %s943_s23, %s1416_s28  ;;  %p1065_p3 = por %p58_p2, %p57_p1 }
  0x15   : > { %p39_p4 = scmp.ge.s32.totalorder %s1418_s29, 3  ;;  %p48_p5 = scmp.eq.s32.totalorder %s46_s4, 0 }
  0x16   : > { %p63_p6 = scmp.ne.s32.totalorder %s927_s19, %s923_s18  ;;  %p1072_p7 = scmp.eq.s32.totalorder %s537_s26, 0 }
  0x17   : > { %s1420_s29 = smov (%p39_p4, %s1418_s29), 0  ;;  %s78_s11 = sadd.s32 1, %s919_s17 }
  0x18   : > { %1372 = sst [smem:[#allocation14_spill]] %s1420_s29  ;;  %p1083_p8 = por %p1072_p7, %p63_p6 }
  0x19   : > { %s1079_s7 = scalar_select %p48_p5, %s931_s20, %s50_s30  }
  0x1a   : > { %s1374_s8 = scalar_select %p1083_p8, 1, 0 }
  0x1b   : > { %1373 = sst [smem:[#allocation15_spill]] %s1079_s7  ;;  %s73_s9 = ssub.s32 %s947_s24, %s1420_s29 }
  0x1c   : > { %s75_s10 = sor.u32 %s73_s9, %s46_s4  ;;  %p85_p10 = scmp.ne.s32.totalorder %s919_s17, %s915_s16 }
  0x1d   : > { %p76_p9 = scmp.eq.s32.totalorder %s75_s10, 0  ;;  %p91_p11 = scmp.ne.s32.totalorder %s915_s16, %s911_s15 }
  0x1e   : > { %p130_p12 = scmp.eq.s32.totalorder %s73_s9, 0  ;;  %p1099_p13 = por %p85_p10, %p58_p2 }
  0x1f   : > { %s1095_s18 = scalar_select %p76_p9, %s919_s17, %s78_s11  }
  0x20   : > { %p1105_p0 = por %p91_p11, %p1072_p7  ;;  %s132_s4 = sadd.s32 1, %s907_s14 }
  0x21   : > { %1375 = sst [smem:[#allocation16_spill]] %s1095_s18  ;;  %p142_p1 = scmp.ne.s32.totalorder %s907_s14, %s903_s13 }
  0x22   : > { %s1377_s27 = scalar_select %p1105_p0, 1, 0 }
  0x23   : > { %s1113_s10 = scalar_select %p130_p12, %s907_s14, %s132_s4  }
  0x24   : > { %p143_p4 = scmp.eq.s32.totalorder %s537_s26, 8  ;;  %p148_p5 = scmp.ne.s32.totalorder %s903_s13, %s899_s12 }
  0x25   : > { %1378 = sst [smem:[#allocation17_spill]] %s1113_s10  ;;  %s1379_s15 = sadd.s32 4294967294, %s951_s25  }
  0x26   : > { %p149_p2 = scmp.eq.s32.totalorder %s1379_s15, 8  ;;  %p1121_p6 = por %p143_p4, %p142_p1 }
  0x27   : > { %p613_p7 = scmp.lt.s32.totalorder %s951_s25, 9  ;;  %s169_s11 = sand.u32 1, %s931_s20  }
  0x28   : > { %s1380_s9 = scalar_select %p1121_p6, 1, 0 }
  0x29   : > { %p1126_p9 = por %p149_p2, %p148_p5  ;;  %s541_s29 = sshll.u32 %s169_s11, 1 }
  0x2a   : > { %s542_s4 = sshll.u32 %s943_s23, 5  ;;  %s1383_s0 = sld [smem:[#allocation19_spill]] }
  0x2b   : > { %s1381_s6 = scalar_select %p1126_p9, 1, 0 }
  0x2c   : > { %s173_s15 = scalar_lea.vmem [#allocation2], %s541_s29  ;;  %p1141_p10 = pnand %p613_p7, %p1065_p3 }
  0x2d   : > { %1382 = sst [smem:[#allocation18_spill]] %s1381_s6  ;;  %s182_s18 = sshll.u32 %s173_s15, 4  ;;  %s1137_s18 = int_to_ptr.vmem [resolvable:$true] %s182_s18 }
  0x2e   : > { %p1148_p11 = pnand %p613_p7, %p1099_p13  ;;  %s170_s7 = scalar_lea.sflag [#allocation3], %s169_s11 }
  0x2f   : > { %p743_p4 = pneg %p1141_p10 }
  0x30   : > { %s1135_s26 = scalar_lea.hbm %s1383_s0, %s542_s4  ;;  %s746_s15 = scalar_lea.hbm %s1383_s0, 96 }
  0x31   : > { %s741_s29 = scalar_lea.hbm %s1135_s26, 32  ;;  %p747_p13 = scmp.lt.u32.totalorder %s1135_s26, %s1383_s0 }
  0x32   : > { %p742_p1 = scmp.ne.s32.totalorder %s1135_s26, %s741_s29  ;;  %p748_p2 = scmp.lt.u32.totalorder %s746_s15, %s741_s29 }
  0x33   : > { %p750_p12 = scmp.lt.u32.totalorder %s741_s29, %s1135_s26 }
  0x34   : > { %p744_p3 = pnand %p743_p4, %p742_p1  ;;  %p749_p7 = por %p748_p2, %p747_p13 }
  0x36   : > { %p745_p5 = pneg %p744_p3  ;;  %p751_p9 = por %p750_p12, %p749_p7 }
  0x38   : > { %p752_p6 = pnand %p751_p9, %p745_p5 }
  0x3a   : > { %755 = shalt.err (!%p752_p6)
}
  0x3b   : > { %s756_s11 = scalar_lea.vmem %s1137_s18, 32  ;;  %s953_s5 = smov [#allocation2]  }
  0x3c   : > { %p757_p1 = scmp.ne.s32.totalorder %s1137_s18, %s756_s11  ;;  %s761_s4 = sshll.u32 %s953_s5, 4  ;;  %s762_s4 = int_to_ptr.vmem [resolvable:$false] %s761_s4 }
  0x3d   : > { %s763_s20 = scalar_lea.vmem %s762_s4, 64  ;;  %p764_p8 = scmp.lt.s32.totalorder %s1137_s18, %s762_s4 }
  0x3e   : > { %p759_p3 = pnand %p757_p1, %p743_p4  ;;  %p765_p13 = scmp.lt.s32.totalorder %s763_s20, %s756_s11 }
  0x40   : > { %p760_p0 = pneg %p759_p3  ;;  %p766_p2 = por %p765_p13, %p764_p8 }
  0x42   : > { %p767_p12 = pnand %p766_p2, %p760_p0 }
  0x44   : > { %770 = shalt.err (!%p767_p12)
}
  0x45   : > { %605 = dma.hbm_to_vmem [thread:$0]  (!%p1141_p10), %s1135_s26, 32, %s1137_s18, %s170_s7  }
  0x46   : > { %s1386_s29 = smul.u32 48, %s947_s24  ;;  %p216_p6 = scmp.lt.s32.totalorder %s951_s25, 10 }
  0x47   : > { %s189_s30 = sand.u32 1, %s919_s17   ;;  %p1387_p8 = scmp.ge.s32.totalorder %s951_s25, 1 }
  0x48   : > { %s199_s15 = sadd.s32 %s943_s23, %s1386_s29  ;;  %s543_s11 = sshll.u32 %s189_s30, 6 }
  0x49   : > { %p1185_p0 = pnand %p1387_p8, %p216_p6  ;;  %s546_s10 = sshll.u32 %s199_s15, 6 }
  0x4a   : > { %s193_s4 = scalar_lea.vmem [#allocation5], %s543_s11  ;;  %s1192_s6 = scalar_lea.hbm %s1355_s1, %s546_s10 }
  0x4b   : > { %s202_s20 = sshll.u32 %s193_s4, 4  ;;  %s1196_s18 = scalar_lea.sflag [#allocation6], %s189_s30  ;;  %s1194_s20 = int_to_ptr.vmem [resolvable:$true] %s202_s20 }
  0x4c   : > { %s771_s26 = scalar_lea.hbm %s1192_s6, 1024  ;;  %p773_p10 = pneg %p1148_p11 }
  0x4d   : > { %p772_p9 = scmp.ne.s32.totalorder %s1192_s6, %s771_s26  ;;  %s776_s14 = scalar_lea.hbm %s1355_s1, 12288 }
  0x4e   : > { %p777_p7 = scmp.lt.u32.totalorder %s1192_s6, %s1355_s1  ;;  %p778_p1 = scmp.lt.u32.totalorder %s776_s14, %s771_s26 }
  0x4f   : > { %p774_p4 = pnand %p773_p10, %p772_p9  ;;  %p780_p13 = scmp.lt.u32.totalorder %s771_s26, %s1192_s6 }
  0x50   : > { %p779_p3 = por %p778_p1, %p777_p7 }
  0x51   : > { %p775_p5 = pneg %p774_p4 }
  0x52   : > { %p781_p2 = por %p780_p13, %p779_p3 }
  0x54   : > { %p782_p12 = pnand %p781_p2, %p775_p5 }
  0x56   : > { %785 = shalt.err (!%p782_p12)
}
  0x57   : > { %s786_s30 = scalar_lea.vmem %s1194_s20, 1024  ;;  %s954_s11 = smov [#allocation5]  }
  0x58   : > { %p787_p6 = scmp.ne.s32.totalorder %s1194_s20, %s786_s30  ;;  %s791_s10 = sshll.u32 %s954_s11, 4  ;;  %s792_s10 = int_to_ptr.vmem [resolvable:$false] %s791_s10 }
  0x59   : > { %s793_s4 = scalar_lea.vmem %s792_s10, 2048  ;;  %p794_p4 = scmp.lt.s32.totalorder %s1194_s20, %s792_s10 }
  0x5a   : > { %p789_p8 = pnand %p787_p6, %p773_p10  ;;  %p795_p7 = scmp.lt.s32.totalorder %s793_s4, %s786_s30 }
  0x5c   : > { %p790_p9 = pneg %p789_p8  ;;  %p796_p1 = por %p795_p7, %p794_p4 }
  0x5e   : > { %p797_p3 = pnand %p796_p1, %p790_p9 }
  0x60   : > { %800 = shalt.err (!%p797_p3)
}
  0x61   : > { %s955_s26 = smov 192   ;;  %s956_s7 = smov 64  }
  0x62   : > { %s957_s0 = smov 4   ;;  %220 = sbr.rel (%p1185_p0) target bundleno = 437 (0x1b5), region = 32 }
  0x63   : > { %608 = dma.hbm_to_vmem [thread:$0]  (!%p1148_p11), %s1192_s6, 1024, %s1194_s20, %s1196_s18, %s955_s26, %s956_s7, %s957_s0  }
  0x64   : > { %s222_s14 = sand.u32 (!%p1185_p0), 1, %s927_s19   ;;  %p1389_p10 = scmp.ne.s32.totalorder (!%p1185_p0), %s1374_s8, 0 }
  0x65   : > { %s1227_s29 = sshll.u32 (!%p1185_p0), %s222_s14, 1  ;;  %s223_s15 = scalar_lea.sflag (!%p1185_p0), [#allocation3], %s222_s14 }
  0x66   : > { %s226_s30 = scalar_lea.vmem (!%p1185_p0), [#allocation2], %s1227_s29 }
  0x69   : > { %886 = dma.done.wait (%p1389_p10), %s223_s15, 32  }
  0x6a   : > { %888 = vsyncadd (%p1389_p10), %s223_s15, 4294967264  ;;  %s231_s28 = sand.u32 1, %s915_s16   ;;  %p1390_p11 = scmp.ne.s32.totalorder %s1377_s27, 0 }
  0x6b   : > { %s549_s6 = sshll.u32 %s231_s28, 6  ;;  %s232_s20 = scalar_lea.sflag [#allocation6], %s231_s28 }
  0x6c   : > { %s1235_s5 = scalar_lea.vmem [#allocation5], %s549_s6 }
  0x6d   : > { %890 = dma.done.wait (%p1390_p11), %s232_s20, 1024  }
  0x6e   : > { %892 = vsyncadd (%p1390_p11), %s232_s20, 4294966272  ;;  %s263_s18 = sand.u32 1, %s903_s13   ;;  %p267_p0 = scmp.lt.s32.totalorder %s939_s22, 3 }
  0x6f   : > { %s550_s8 = sshll.u32 %s263_s18, 2  ;;  %p551_p5 = scmp.ne.s32.totalorder %s935_s21, 0 }
  0x70   : > { %s1246_s11 = scalar_select %p267_p0, %s939_s22, 3 }
  0x71   : > { %s1252_s7 = scalar_lea.vmem [#allocation7], %s550_s8  ;;  %274 = sbr.rel (%p551_p5) target bundleno = 120 (0x78), region = 44  ;;  %v958_v0 = vmov (!%p551_p5), 0.0  }
  0x72   : > { %s269_s26 = scalar_lea.vmem %s1356_s2, %s1246_s11  ;;  %275 = vst [vmem:[%s1252_s7] sm:$0xf] (!%p551_p5), %v958_v0 }
  0x78 PF: > { %v733_v1 = vld [vmem:[%s1235_s5] sm:$0xff]   ;;  %v959_v2 = vmov 0.0   ;;  %vm960_vm0 = vmmov 0   ;;  %v734_v3 = vld [vmem:[%s1235_s5 + $0x8] sm:$0xff]   ;;  %v735_v4 = vld [vmem:[%s1235_s5 + $0x10] sm:$0xff]   ;;  %p560_p13 = scmp.ne.s32.totalorder %s935_s21, 2 }
  0x79   : > { %575 = vmatprep.subr.bf16.mxu0 %v959_v2  ;;  %591 = vmatprep.mubr.msk.bf16.mxu0 %vm960_vm0, %v959_v2  ;;  %v736_v5 = vld [vmem:[%s1235_s5 + $0x18] sm:$0xff]   ;;  %v737_v6 = vld [vmem:[%s1235_s5 + $0x20] sm:$0xff]   ;;  %v738_v7 = vld [vmem:[%s1235_s5 + $0x28] sm:$0xff]  }
  0x7a   : > { %576 = vmatpush3.bf16.xpose.msra.mxu0 %v733_v1  ;;  %v739_v8 = vld [vmem:[%s1235_s5 + $0x30] sm:$0xff]   ;;  %v740_v9 = vld [vmem:[%s1235_s5 + $0x38] sm:$0xff]   ;;  %v276_v11 = vld [vmem:[%s1252_s7] sm:$0xf] }
  0x7b   : > { %577 = vmatprep.subr.bf16.mxu0 %v959_v2  ;;  %v277_v10 = vld [vmem:[%s226_s30] sm:$0x3] }
  0x7c   : > { %v561_v18 = vld [vmem:[%s269_s26] ss:$0 sm:$0xff] (!%p560_p13) }
  0x82   : > { %578 = vmatpush3.bf16.xpose.msra.mxu0 %v734_v3 }
  0x83   : > { %579 = vmatprep.subr.bf16.mxu0 %v959_v2 }
  0x8a   : > { %580 = vmatpush3.bf16.xpose.msra.mxu0 %v735_v4 }
  0x8b   : > { %581 = vmatprep.subr.bf16.mxu0 %v959_v2 }
  0x92   : > { %582 = vmatpush3.bf16.xpose.msra.mxu0 %v736_v5 }
  0x93   : > { %583 = vmatprep.subr.bf16.mxu0 %v959_v2 }
  0x9a   : > { %584 = vmatpush3.bf16.xpose.msra.mxu0 %v737_v6 }
  0x9b   : > { %585 = vmatprep.subr.bf16.mxu0 %v959_v2 }
  0xa2   : > { %586 = vmatpush3.bf16.xpose.msra.mxu0 %v738_v7 }
  0xa3   : > { %587 = vmatprep.subr.bf16.mxu0 %v959_v2 }
  0xaa   : > { %588 = vmatpush3.bf16.xpose.msra.mxu0 %v739_v8 }
  0xab   : > { %589 = vmatprep.subr.bf16.mxu0 %v959_v2 }
  0xb2   : > { %590 = vmatpush3.bf16.xpose.msra.mxu0 %v740_v9 }
  0xb9   : > { %592 = vmatmul.mubr.bf16.vlgmr.msra.gmra.mrb[0].mxu0 %v277_v10 }
 0x189   : > { %387 = sbr.rel (%p560_p13) target bundleno = 412 (0x19c), region = 48 }
 0x18c   : > { %v376_v12 = vpop.f32.mrb[0].mxu0 }
 0x18d   : > { %v382_v13 = vadd.f32 %v376_v12, %v276_v11  ;;  %v593_v14 = vpop.f32.mrb[1].mxu0 }
 0x18e   : > { %v379_v15 = vpop.f32.mrb[2].mxu0 }
 0x18f   : > { %383 = vst [vmem:[%s1252_s7] sm:$0xf] %v382_v13  ;;  %v594_v16 = vpop.f32.mrb[3].mxu0 }
 0x196   : > { %v388_v17 = vld [vmem:[%s1252_s7] sm:$0xf] }
 0x197   : > { %v396_v19 = vadd.f32 %v561_v18, %v388_v17 }
 0x199   : > { %v397_v20 = vmul.f32 0.5, %v396_v19 }
 0x19b   : > { %398 = vst [vmem:[%s1252_s7] sm:$0xf] %v397_v20 }
 0x19c PF: > { %s563_s14 = sshll.u32 %s939_s22, 6  ;;  %s415_s30 = sshll.u32 %s1252_s7, 4  ;;  %s416_s30 = int_to_ptr.vmem [resolvable:$true] %s415_s30 }
 0x19d   : > { %s1280_s15 = scalar_lea.hbm %s1357_s3, %s563_s14  ;;  %s400_s28 = scalar_lea.sflag [#allocation4], %s263_s18 }
 0x19e   : > { %s801_s6 = scalar_lea.vmem %s416_s30, 64  ;;  %p1391_p12 = scmp.ne.s32.totalorder %s1380_s9, 0 }
 0x19f   : > { %p802_p2 = scmp.ne.s32.totalorder %s416_s30, %s801_s6  ;;  %s961_s20 = smov [#allocation7]  }
 0x1a0   : > { %s805_s5 = sshll.u32 %s961_s20, 4  ;;  %s806_s5 = int_to_ptr.vmem [resolvable:$false] %s805_s5 }
 0x1a1   : > { %p803_p6 = pnand %p802_p2, %p1391_p12  ;;  %s807_s8 = scalar_lea.vmem %s806_s5, 128 }
 0x1a2   : > { %p808_p9 = scmp.lt.s32.totalorder %s416_s30, %s806_s5  ;;  %p809_p4 = scmp.lt.s32.totalorder %s807_s8, %s801_s6 }
 0x1a3   : > { %p804_p8 = pneg %p803_p6 }
 0x1a4   : > { %p810_p7 = por %p809_p4, %p808_p9 }
 0x1a6   : > { %p811_p1 = pnand %p810_p7, %p804_p8 }
 0x1a8   : > { %814 = shalt.err (!%p811_p1)
}
 0x1a9   : > { %s815_s22 = scalar_lea.hbm %s1280_s15, 64  ;;  %s819_s10 = scalar_lea.hbm %s1357_s3, 192 }
 0x1aa   : > { %p816_p3 = scmp.ne.s32.totalorder %s1280_s15, %s815_s22  ;;  %p820_p0 = scmp.lt.u32.totalorder %s1280_s15, %s1357_s3 }
 0x1ab   : > { %p821_p5 = scmp.lt.u32.totalorder %s819_s10, %s815_s22  ;;  %p823_p2 = scmp.lt.u32.totalorder %s815_s22, %s1280_s15 }
 0x1ac   : > { %p817_p10 = pnand %p816_p3, %p1391_p12 }
 0x1ad   : > { %p822_p13 = por %p821_p5, %p820_p0 }
 0x1ae   : > { %p818_p11 = pneg %p817_p10 }
 0x1af   : > { %p824_p6 = por %p823_p2, %p822_p13 }
 0x1b1   : > { %p825_p8 = pnand %p824_p6, %p818_p11 }
 0x1b3   : > { %828 = shalt.err (!%p825_p8)
}
 0x1b4   : > { %600 = dma.vmem_to_hbm [thread:$0]  (%p1391_p12), %s416_s30, 64, %s1280_s15, %s400_s28  }
 0x1b5 PF: > { %s1392_s7 = sld [smem:[#allocation18_spill]]  ;;  %p614_p9 = scmp.ge.s32.totalorder %s951_s25, 2 }
 0x1b6   : > { %s427_s27 = sand.u32 1, %s899_s12  }
 0x1b7   : > { %s428_s0 = scalar_lea.sflag [#allocation4], %s427_s27 }
 0x1bb   : > { %p1393_p4 = scmp.ne.s32.totalorder %s1392_s7, 0 }
 0x1bd   : > { %p610_p7 = pnand %p614_p9, %p1393_p4 }
 0x1bf   : > { %894 = dma.done.wait (!%p610_p7), %s428_s0, 64  }
 0x1c0   : > { %896 = vsyncadd (!%p610_p7), %s428_s0, 4294967232  ;;  %s22_s25 = sadd.s32 1, %s951_s25   ;;  %s1395_s9 = sld [smem:[#allocation11_spill]] }
 0x1c1   : > { %p1307_p1 = scmp.ge.s32.totalorder %s22_s25, 11   ;;  %s1396_s21 = sld [smem:[#allocation17_spill]] }
 0x1c2   : > { %s1397_s29 = sld [smem:[#allocation16_spill]]  ;;  %s1398_s30 = sld [smem:[#allocation12_spill]] }
 0x1c3   : > { %s1399_s20 = sld [smem:[#allocation15_spill]]  ;;  %s1400_s28 = sld [smem:[#allocation13_spill]] }
 0x1c4   : > { %s1401_s6 = sld [smem:[#allocation14_spill]]  ;;  %s1403_s12 = smov %s903_s13 }
 0x1c5   : > { %s1406_s15 = smov %s915_s16  ;;  %s1407_s16 = smov %s919_s17 }
 0x1c6   : > { %s1404_s13 = smov %s1395_s9  ;;  %s1409_s18 = smov %s927_s19 }
 0x1c7   : > { %s1405_s14 = smov %s1396_s21  ;;  %s1411_s21 = smov %s943_s23 }
 0x1c8   : > { %s1408_s17 = smov %s1397_s29  ;;  %s1410_s19 = smov %s1398_s30 }
 0x1c9   : > { %s1412_s22 = smov %s947_s24  ;;  %s1413_s23 = smov %s1400_s28 }
 0x1ca   : > { %s1414_s24 = smov %s1401_s6  ;;  %21 = sbr.rel (!%p1307_p1) target bundleno = 14 (0xe), region = 101 }
 0x1d1   :  { %433 = vsyncpa [#allocation3], 1 }
 0x1d2   :  { %435 = vsyncpa [#allocation3 + $0x1], 1 }
 0x1d3   :  { %436 = vsyncpa [#allocation6], 1 }
 0x1d4   :  { %438 = vsyncpa [#allocation6 + $0x1], 1 }
 0x1d5   :  { %439 = vsyncpa [#allocation4], 1 }
 0x1d6   :  { %441 = vsyncpa [#allocation4 + $0x1], 1 }

</bundles_post_ra>
